<compile_context>
chip_gen: v7x
topology: tpu7x:2x2x1
jax: 0.10.0
libtpu: 0.0.40
codegen_flags: <defaults>
</compile_context>

<pallas_src>
import functools
import math

import jax
import jax.numpy as jnp
from jax.experimental import pallas as pl
from jax.experimental.pallas import tpu as pltpu

LEAKY_SLOPE = 0.01       # F.leaky_relu default negative_slope
LANE = 128               # lane width; interior feature dims are padded to this
SUBLANE = 8
MAX_TILE_B = 2048        # batch tile for large batches


def _round_up(x, m):
    return ((x + m - 1) // m) * m


def _fused_mlp_kernel(*refs, num_layers):
    """Whole FCCNetwork forward for one batch tile.

    refs = [x_ref, w0, b0, w1, b1, ..., w_{L-1}, b_{L-1}, o_ref]
    x is bf16 (tile_b, F_true).  Weights are bf16 (K, N) with interior dims
    zero-padded to 128; biases are f32 (1, N).  Matmuls run bf16->f32 on the
    MXU; bias add + leaky_relu run in f32 on the VPU; the activation never
    leaves VMEM across layers.
    """
    x_ref = refs[0]
    o_ref = refs[-1]
    wb = refs[1:-1]

    h = x_ref[...]
    if h.dtype != jnp.bfloat16:
        h = h.astype(jnp.bfloat16)
    for li in range(num_layers):                           # unrolled at trace time
        w = wb[2 * li][...]                                # (K, N) bf16
        b = wb[2 * li + 1][...]                            # (1, N) f32
        h = jnp.dot(h, w, preferred_element_type=jnp.float32) + b
        if li < num_layers - 1:                            # hidden layers only
            h = jnp.maximum(h, LEAKY_SLOPE * h)            # leaky_relu
            h = h.astype(jnp.bfloat16)                     # MXU-native for next layer
    o_ref[...] = h.astype(o_ref.dtype)


def prepare_fcc_params(params):
    """One-time parameter prep (hoisted out of the forward pass).

    params: [(w, b)] with w (in, out) f32, b (1, out) f32 (PyTorch-equivalent).
    Returns bf16 weights / f32 biases with interior dims zero-padded to the
    128-lane width.  The first layer's K and the last layer's N stay at their
    true widths so x needs no feature padding and the output needs no slice.
    """
    num_layers = len(params)
    prepped = []
    for li, (w, b) in enumerate(params):
        k, n = w.shape
        kp = k if li == 0 else _round_up(k, LANE)
        np_ = n if li == num_layers - 1 else _round_up(n, LANE)
        wp = jnp.zeros((kp, np_), jnp.bfloat16).at[:k, :n].set(
            w.astype(jnp.bfloat16))
        bp = jnp.zeros((1, np_), jnp.float32).at[:, :n].set(
            b.astype(jnp.float32))
        prepped.append((wp, bp))
    return prepped


def fcc_network_forward(x, prepped_params):
    """Fused forward pass.  x: (B, in_features); prepped_params from
    prepare_fcc_params().  Returns (B, out_features) f32."""
    B, F = x.shape
    num_layers = len(prepped_params)
    assert prepped_params[0][0].shape[0] == F, "in_features mismatch"
    out_features = prepped_params[-1][0].shape[1]

    # bf16 activation stream (math already rounds x through bf16).
    if x.dtype != jnp.bfloat16:
        x = x.astype(jnp.bfloat16)

    # ---- batch tiling: >=2 tiles when possible (v7x dual-TC sharding),
    #      big tiles to amortize per-grid-step overhead ----
    b8 = _round_up(B, SUBLANE)
    if b8 > SUBLANE:
        tile_b = min(MAX_TILE_B, _round_up(-(-b8 // 2), SUBLANE))
    else:
        tile_b = b8
    b_pad = _round_up(b8, tile_b)
    if b_pad != B:
        x = jnp.zeros((b_pad, F), x.dtype).at[:B].set(x)   # pad batch rows only
    grid = (b_pad // tile_b,)

    in_specs = [pl.BlockSpec((tile_b, F), lambda i: (i, 0))]
    flat_inputs = [x]
    for (wp, bp) in prepped_params:
        # Constant index_map -> weights/bias stay VMEM-resident across tiles.
        in_specs.append(pl.BlockSpec(wp.shape, lambda i: (0, 0)))
        in_specs.append(pl.BlockSpec(bp.shape, lambda i: (0, 0)))
        flat_inputs.append(wp)
        flat_inputs.append(bp)
    out_specs = pl.BlockSpec((tile_b, out_features), lambda i: (i, 0))

    flops = sum(2 * b_pad * wp.shape[0] * wp.shape[1]
                for (wp, _) in prepped_params)
    bytes_accessed = (
        b_pad * F * 2 + b_pad * out_features * 4
        + sum(wp.size * 2 + bp.size * 4 for (wp, bp) in prepped_params))

    kernel = functools.partial(_fused_mlp_kernel, num_layers=num_layers)
    out_full = pl.pallas_call(
        kernel,
        out_shape=jax.ShapeDtypeStruct((b_pad, out_features), jnp.float32),
        grid=grid,
        in_specs=in_specs,
        out_specs=out_specs,
        compiler_params=pltpu.CompilerParams(
            dimension_semantics=("parallel",)),
        cost_estimate=pl.CostEstimate(
            flops=flops, transcendentals=0, bytes_accessed=bytes_accessed),
    )(*flat_inputs)

    if b_pad == B:
        return out_full
    return out_full[:B]


def init_fcc_params(key, in_features, num_hidden_features, num_output_features,
                    num_hidden_layers):
    """Deterministic parameter init (PyTorch-Linear-like uniform fan_in scaling)."""
    params = []
    fan_in = in_features
    for _ in range(num_hidden_layers):
        key, kw, kb = jax.random.split(key, 3)
        bound = 1.0 / math.sqrt(fan_in)
        w = jax.random.uniform(kw, (fan_in, num_hidden_features), jnp.float32,
                               -bound, bound)
        b = jax.random.uniform(kb, (1, num_hidden_features), jnp.float32,
                               -bound, bound)
        params.append((w, b))
        fan_in = num_hidden_features
    key, kw, kb = jax.random.split(key, 3)
    bound = 1.0 / math.sqrt(fan_in)
    w_out = jax.random.uniform(kw, (fan_in, num_output_features), jnp.float32,
                               -bound, bound)
    b_out = jax.random.uniform(kb, (1, num_output_features), jnp.float32,
                               -bound, bound)
    params.append((w_out, b_out))
    return params


def fcc_network_reference(x, params):
    """Pure-JAX reference matching the kernel's bf16-matmul / f32-accumulate
    numerics (inputs/weights rounded through bf16; everything else f32)."""
    def bf16(v):
        return v.astype(jnp.bfloat16).astype(jnp.float32)
    out = x
    for (w, b) in params[:-1]:
        out = jnp.dot(bf16(out), bf16(w)) + b
        out = jnp.maximum(out, LEAKY_SLOPE * out)
    w_o, b_o = params[-1]
    return jnp.dot(bf16(out), bf16(w_o)) + b_o


if __name__ == "__main__":
    # Small shapes implied by the module: flat feature input (B, in_features).
    batch = 8
    in_features = 32
    num_hidden_features = 32
    num_output_features = 16
    num_hidden_layers = 2

    key = jax.random.PRNGKey(0)
    key, kx = jax.random.split(key)
    x = jax.random.normal(kx, (batch, in_features), jnp.float32)

    params = init_fcc_params(key, in_features, num_hidden_features,
                             num_output_features, num_hidden_layers)
    prepped = prepare_fcc_params(params)   # one-time prep, hoisted out of forward

    out = fcc_network_forward(x, prepped)
    out = jax.block_until_ready(out)

    ref = fcc_network_reference(x, params)
    assert out.shape == (batch, num_output_features)
    # bf16 matmul inputs (f32 accumulation) -> loosened tolerance vs f32 ref.
    assert jnp.allclose(out, ref, atol=1e-2, rtol=1e-2), (
        float(jnp.max(jnp.abs(out - ref))))

    print("KERNEL_OK")
</pallas_src>

<mosaic_0001>
module attributes {stable_mosaic.version = 11 : i64} {
  func.func @_fused_mlp_kernel(%arg0: i32, %arg1: memref<8x32xbf16, #tpu.memory_space<vmem>>, %arg2: memref<32x128xbf16, #tpu.memory_space<vmem>>, %arg3: memref<1x128xf32, #tpu.memory_space<vmem>>, %arg4: memref<128x128xbf16, #tpu.memory_space<vmem>>, %arg5: memref<1x128xf32, #tpu.memory_space<vmem>>, %arg6: memref<128x16xbf16, #tpu.memory_space<vmem>>, %arg7: memref<1x16xf32, #tpu.memory_space<vmem>>, %arg8: memref<8x16xf32, #tpu.memory_space<vmem>>) attributes {dimension_semantics = [#tpu.dimension_semantics<parallel>], iteration_bounds = array<i64: 1>, scalar_prefetch = 0 : i64, scratch_operands = 0 : i64, tpu.core_type = #tpu.core_type<tc>, window_params = [{transform_indices = @transform_0, window_bounds = array<i64: 8, 32>}, {pipeline_mode = #tpu.pipeline_mode<synchronous>, transform_indices = @transform_1, window_bounds = array<i64: 32, 128>}, {pipeline_mode = #tpu.pipeline_mode<synchronous>, transform_indices = @transform_2, window_bounds = array<i64: 1, 128>}, {pipeline_mode = #tpu.pipeline_mode<synchronous>, transform_indices = @transform_3, window_bounds = array<i64: 128, 128>}, {pipeline_mode = #tpu.pipeline_mode<synchronous>, transform_indices = @transform_4, window_bounds = array<i64: 1, 128>}, {pipeline_mode = #tpu.pipeline_mode<synchronous>, transform_indices = @transform_5, window_bounds = array<i64: 128, 16>}, {pipeline_mode = #tpu.pipeline_mode<synchronous>, transform_indices = @transform_6, window_bounds = array<i64: 1, 16>}, {transform_indices = @transform_7, window_bounds = array<i64: 8, 16>}]} {
    %c0 = arith.constant 0 : index
    %c0_0 = arith.constant 0 : index
    %0 = vector.load %arg1[%c0, %c0_0] : memref<8x32xbf16, #tpu.memory_space<vmem>>, vector<8x32xbf16>
    %c0_1 = arith.constant 0 : index
    %c0_2 = arith.constant 0 : index
    %1 = vector.load %arg2[%c0_1, %c0_2] : memref<32x128xbf16, #tpu.memory_space<vmem>>, vector<32x128xbf16>
    %c0_3 = arith.constant 0 : index
    %c0_4 = arith.constant 0 : index
    %2 = vector.load %arg3[%c0_3, %c0_4] : memref<1x128xf32, #tpu.memory_space<vmem>>, vector<1x128xf32>
    %cst = arith.constant dense<0.000000e+00> : vector<8x128xf32>
    %3 = tpu.matmul %0, %1, %cst {dimension_numbers = #tpu.dot_dimension_numbers<[1], [0], [0], [1], [0, 0, 1, 1], [], []>} : vector<8x32xbf16>, vector<32x128xbf16>, vector<8x128xf32> -> vector<8x128xf32>
    %4 = vector.broadcast %2 : vector<1x128xf32> to vector<8x128xf32>
    %5 = arith.addf %3, %4 : vector<8x128xf32>
    %cst_5 = arith.constant 0.00999999977 : f32
    %6 = vector.broadcast %cst_5 : f32 to vector<8x128xf32>
    %7 = arith.mulf %6, %5 : vector<8x128xf32>
    %8 = arith.maximumf %5, %7 : vector<8x128xf32>
    %9 = arith.truncf %8 : vector<8x128xf32> to vector<8x128xbf16>
    %c0_6 = arith.constant 0 : index
    %c0_7 = arith.constant 0 : index
    %10 = vector.load %arg4[%c0_6, %c0_7] : memref<128x128xbf16, #tpu.memory_space<vmem>>, vector<128x128xbf16>
    %c0_8 = arith.constant 0 : index
    %c0_9 = arith.constant 0 : index
    %11 = vector.load %arg5[%c0_8, %c0_9] : memref<1x128xf32, #tpu.memory_space<vmem>>, vector<1x128xf32>
    %cst_10 = arith.constant dense<0.000000e+00> : vector<8x128xf32>
    %12 = tpu.matmul %9, %10, %cst_10 {dimension_numbers = #tpu.dot_dimension_numbers<[1], [0], [0], [1], [0, 0, 1, 1], [], []>} : vector<8x128xbf16>, vector<128x128xbf16>, vector<8x128xf32> -> vector<8x128xf32>
    %13 = vector.broadcast %11 : vector<1x128xf32> to vector<8x128xf32>
    %14 = arith.addf %12, %13 : vector<8x128xf32>
    %cst_11 = arith.constant 0.00999999977 : f32
    %15 = vector.broadcast %cst_11 : f32 to vector<8x128xf32>
    %16 = arith.mulf %15, %14 : vector<8x128xf32>
    %17 = arith.maximumf %14, %16 : vector<8x128xf32>
    %18 = arith.truncf %17 : vector<8x128xf32> to vector<8x128xbf16>
    %c0_12 = arith.constant 0 : index
    %c0_13 = arith.constant 0 : index
    %19 = vector.load %arg6[%c0_12, %c0_13] : memref<128x16xbf16, #tpu.memory_space<vmem>>, vector<128x16xbf16>
    %c0_14 = arith.constant 0 : index
    %c0_15 = arith.constant 0 : index
    %20 = vector.load %arg7[%c0_14, %c0_15] : memref<1x16xf32, #tpu.memory_space<vmem>>, vector<1x16xf32>
    %cst_16 = arith.constant dense<0.000000e+00> : vector<8x16xf32>
    %21 = tpu.matmul %18, %19, %cst_16 {dimension_numbers = #tpu.dot_dimension_numbers<[1], [0], [0], [1], [0, 0, 1, 1], [], []>} : vector<8x128xbf16>, vector<128x16xbf16>, vector<8x16xf32> -> vector<8x16xf32>
    %22 = vector.broadcast %20 : vector<1x16xf32> to vector<8x16xf32>
    %23 = arith.addf %21, %22 : vector<8x16xf32>
    %c0_17 = arith.constant 0 : index
    %c0_18 = arith.constant 0 : index
    %24 = vector.load %arg8[%c0_17, %c0_18] : memref<8x16xf32, #tpu.memory_space<vmem>>, vector<8x16xf32>
    tpu.vector_store %arg8[%c0_17, %c0_18], %23 {strides = array<i32>} : memref<8x16xf32, #tpu.memory_space<vmem>>, vector<8x16xf32>,
    return
  }
  func.func @transform_0(%arg0: i32) -> (i32, i32) {
    %c0_i32 = arith.constant 0 : i32
    %c0_i32_0 = arith.constant 0 : i32
    return %arg0, %c0_i32 : i32, i32
  }
  func.func @transform_1(%arg0: i32) -> (i32, i32) {
    %c0_i32 = arith.constant 0 : i32
    %c0_i32_0 = arith.constant 0 : i32
    %c0_i32_1 = arith.constant 0 : i32
    return %c0_i32, %c0_i32_0 : i32, i32
  }
  func.func @transform_2(%arg0: i32) -> (i32, i32) {
    %c0_i32 = arith.constant 0 : i32
    %c0_i32_0 = arith.constant 0 : i32
    %c0_i32_1 = arith.constant 0 : i32
    return %c0_i32, %c0_i32_0 : i32, i32
  }
  func.func @transform_3(%arg0: i32) -> (i32, i32) {
    %c0_i32 = arith.constant 0 : i32
    %c0_i32_0 = arith.constant 0 : i32
    %c0_i32_1 = arith.constant 0 : i32
    return %c0_i32, %c0_i32_0 : i32, i32
  }
  func.func @transform_4(%arg0: i32) -> (i32, i32) {
    %c0_i32 = arith.constant 0 : i32
    %c0_i32_0 = arith.constant 0 : i32
    %c0_i32_1 = arith.constant 0 : i32
    return %c0_i32, %c0_i32_0 : i32, i32
  }
  func.func @transform_5(%arg0: i32) -> (i32, i32) {
    %c0_i32 = arith.constant 0 : i32
    %c0_i32_0 = arith.constant 0 : i32
    %c0_i32_1 = arith.constant 0 : i32
    return %c0_i32, %c0_i32_0 : i32, i32
  }
  func.func @transform_6(%arg0: i32) -> (i32, i32) {
    %c0_i32 = arith.constant 0 : i32
    %c0_i32_0 = arith.constant 0 : i32
    %c0_i32_1 = arith.constant 0 : i32
    return %c0_i32, %c0_i32_0 : i32, i32
  }
  func.func @transform_7(%arg0: i32) -> (i32, i32) {
    %c0_i32 = arith.constant 0 : i32
    %c0_i32_0 = arith.constant 0 : i32
    return %arg0, %c0_i32 : i32, i32
  }
}

</mosaic_0001>

<bundles_post_ra>
// kernel: tpu_custom_call.1
= control target key start
LH: loop header
LB: loop body
LE: loop exit
PB: predicated region body
PF: predicated region fallthrough
CT: control target
= control target key end

     0   :  { %12 = vsyncpa [#allocation3], 0  ;;  %s669_s0 = inlined_call_operand.hbm [shape: bf16[8,32], index: 0, kind: input, shape index: {}]   ;;  %s670_s1 = inlined_call_operand.vmem [shape: bf16[32,128], index: 1, kind: input, shape index: {}]   ;;  %s671_s2 = inlined_call_operand.vmem [shape: f32[1,128], index: 2, kind: input, shape index: {}]   ;;  %s672_s3 = inlined_call_operand.vmem [shape: bf16[128,128], index: 3, kind: input, shape index: {}]   ;;  %s673_s4 = inlined_call_operand.vmem [shape: f32[1,128], index: 4, kind: input, shape index: {}]   ;;  %s674_s5 = inlined_call_operand.vmem [shape: bf16[128,16], index: 5, kind: input, shape index: {}]   ;;  %s675_s6 = inlined_call_operand.vmem [shape: f32[1,16], index: 6, kind: input, shape index: {}]   ;;  %s676_s7 = inlined_call_operand.hbm [shape: f32[8,16], index: 7, kind: output, shape index: {}]  }
   0x1   :  { %13 = vsyncpa [#allocation4], 0  ;;  %s514_s24 = smov [#allocation2]   ;;  %s466_s28 = scalar_lea.hbm %s669_s0, 64 }
   0x2   :  { %s20_s25 = sshll.u32 %s514_s24, 4  ;;  %p467_p0 = scmp.ne.s32.totalorder %s669_s0, %s466_s28  ;;  %s21_s25 = int_to_ptr.vmem [resolvable:$true] %s20_s25 }
   0x3   :  { %p470_p1 = scmp.lt.u32.totalorder %s466_s28, %s669_s0 }
   0x5   :  { %p472_p2 = pnand %p470_p1, %p467_p0 }
   0x7   :  { %475 = shalt.err (!%p472_p2)
}
   0x8   :  { %s476_s10 = scalar_lea.vmem %s21_s25, 64  ;;  %p481_p4 = scmp.lt.s32.totalorder %s21_s25, %s21_s25 }
   0x9   :  { %p477_p3 = scmp.ne.s32.totalorder %s21_s25, %s476_s10  ;;  %p482_p5 = scmp.lt.s32.totalorder %s476_s10, %s476_s10 }
   0xb   :  { %p483_p6 = por %p482_p5, %p481_p4 }
   0xd   :  { %p484_p7 = pnand %p483_p6, %p477_p3 }
   0xf   :  { %487 = shalt.err (!%p484_p7)
}
  0x10   :  { %23 = dma.hbm_to_vmem [thread:$0]  %s669_s0, 64, %s21_s25, [#allocation3]  }
  0x11   :  { %510 = dma.done.wait [#allocation3], 64  }
  0x12   :  { %511 = vsyncadd [#allocation3], 4294967232  ;;  %v515_v0 = vmov 0.0   ;;  %vm516_vm0 = vmmov 0   ;;  %v448_v1 = vld [vmem:[%s670_s1] sm:$0xff]   ;;  %v449_v2 = vld [vmem:[%s670_s1 + $0x8] sm:$0xff]  }
  0x13   :  { %396 = vmatprep.subr.bf16.mxu0 %v515_v0  ;;  %400 = vmatprep.mubr.msk.bf16.mxu0 %vm516_vm0, %v515_v0  ;;  %v450_v3 = vld [vmem:[%s672_s3] sm:$0xff]   ;;  %vm64_vm1 = vcmask 261120   ;;  %v451_v4 = vld [vmem:[%s672_s3 + $0x8] sm:$0xff]   ;;  %v452_v6 = vld [vmem:[%s672_s3 + $0x10] sm:$0xff]   ;;  %s517_s26 = smov [#allocation5]   ;;  %vm336_vm2 = vcmask 130048  }
  0x14   :  { %404 = vmatprep.subr.bf16.mxu1 %v515_v0  ;;  %420 = vmatprep.mubr.msk.bf16.mxu1 %vm516_vm0, %v515_v0  ;;  %v40_v5 = vld [vmem:[#allocation2] sm:$0xf]  ;;  %v453_v7 = vld [vmem:[%s672_s3 + $0x18] sm:$0xff]   ;;  %v455_v9 = vld [vmem:[%s672_s3 + $0x28] sm:$0xff]  }
  0x15   :  { %397 = vmatpush3.bf16.msra.mxu0 %v448_v1  ;;  %405 = vmatpush3.bf16.msra.mxu1 %v450_v3  ;;  %v454_v8 = vld [vmem:[%s672_s3 + $0x20] sm:$0xff]   ;;  %v456_v10 = vld [vmem:[%s672_s3 + $0x30] sm:$0xff]   ;;  %v457_v11 = vld [vmem:[%s672_s3 + $0x38] sm:$0xff]  }
  0x16   :  { %398 = vmatprep.subr.bf16.mxu0 %v515_v0  ;;  %406 = vmatprep.subr.bf16.mxu1 %v515_v0  ;;  %v458_v12 = vld [vmem:[%s674_s5] sm:$0xff]   ;;  %v459_v13 = vld [vmem:[%s674_s5 + $0x8] sm:$0xff]   ;;  %v460_v14 = vld [vmem:[%s674_s5 + $0x10] sm:$0xff]  }
  0x17   :  { %v461_v15 = vld [vmem:[%s674_s5 + $0x18] sm:$0xff]   ;;  %v462_v16 = vld [vmem:[%s674_s5 + $0x20] sm:$0xff]   ;;  %v463_v17 = vld [vmem:[%s674_s5 + $0x28] sm:$0xff]  }
  0x18   :  { %v353_v18 = vld [vmem:[%s671_s2] ss:$0 sm:$0xff]  ;;  %v464_v27 = vld [vmem:[%s674_s5 + $0x30] sm:$0xff]   ;;  %v465_v28 = vld [vmem:[%s674_s5 + $0x38] sm:$0xff]   ;;  %s344_s5 = sshll.u32 %s517_s26, 4  ;;  %s345_s5 = int_to_ptr.vmem [resolvable:$true] %s344_s5 }
  0x19   :  { %399 = vmatpush3.bf16.msra.mxu0 %v449_v2  ;;  %407 = vmatpush3.bf16.msra.mxu1 %v451_v4  ;;  %v357_v29 = vld [vmem:[%s673_s4] ss:$0 sm:$0xff]  ;;  %s488_s4 = scalar_lea.vmem %s345_s5, 128  ;;  %p493_p9 = scmp.lt.s32.totalorder %s345_s5, %s345_s5 }
  0x1a   :  { %424 = vmatprep.subr.bf16.mxu0 %v515_v0  ;;  %408 = vmatprep.subr.bf16.mxu1 %v515_v0  ;;  %v366_v38 = vld [vmem:[%s675_s6] ss:$0 sm:$0xff]  ;;  %p489_p8 = scmp.ne.s32.totalorder %s345_s5, %s488_s4  ;;  %p494_p10 = scmp.lt.s32.totalorder %s488_s4, %s488_s4 }
  0x1c   :  { %401 = vmatmul.mubr.msk.bf16.vlgmr.msra.gmra.mrb[0].mxu0 %vm64_vm1, %v40_v5  ;;  %p495_p11 = por %p494_p10, %p493_p9 }
  0x1d   :  { %440 = vmatprep.mubr.msk.bf16.mxu0 %vm516_vm0, %v515_v0  ;;  %409 = vmatpush3.bf16.msra.mxu1 %v452_v6 }
  0x1e   :  { %410 = vmatprep.subr.bf16.mxu1 %v515_v0  ;;  %425 = vmatpush3.bf16.msra.mxu0 %v458_v12  ;;  %p496_p12 = pnand %p495_p11, %p489_p8 }
  0x1f   :  { %426 = vmatprep.subr.bf16.mxu0 %v515_v0 }
  0x21   :  { %411 = vmatpush3.bf16.msra.mxu1 %v453_v7 }
  0x22   :  { %412 = vmatprep.subr.bf16.mxu1 %v515_v0  ;;  %427 = vmatpush3.bf16.msra.mxu0 %v459_v13 }
  0x23   :  { %428 = vmatprep.subr.bf16.mxu0 %v515_v0 }
  0x25   :  { %413 = vmatpush3.bf16.msra.mxu1 %v454_v8 }
  0x26   :  { %414 = vmatprep.subr.bf16.mxu1 %v515_v0  ;;  %429 = vmatpush3.bf16.msra.mxu0 %v460_v14 }
  0x27   :  { %430 = vmatprep.subr.bf16.mxu0 %v515_v0 }
  0x29   :  { %415 = vmatpush3.bf16.msra.mxu1 %v455_v9 }
  0x2a   :  { %416 = vmatprep.subr.bf16.mxu1 %v515_v0  ;;  %431 = vmatpush3.bf16.msra.mxu0 %v461_v15 }
  0x2b   :  { %432 = vmatprep.subr.bf16.mxu0 %v515_v0 }
  0x2d   :  { %417 = vmatpush3.bf16.msra.mxu1 %v456_v10 }
  0x2e   :  { %418 = vmatprep.subr.bf16.mxu1 %v515_v0  ;;  %433 = vmatpush3.bf16.msra.mxu0 %v462_v16 }
  0x2f   :  { %434 = vmatprep.subr.bf16.mxu0 %v515_v0 }
  0x31   :  { %419 = vmatpush3.bf16.msra.mxu1 %v457_v11 }
  0x32   :  { %435 = vmatpush3.bf16.msra.mxu0 %v463_v17 }
  0x33   :  { %436 = vmatprep.subr.bf16.mxu0 %v515_v0 }
  0x36   :  { %437 = vmatpush3.bf16.msra.mxu0 %v464_v27 }
  0x37   :  { %438 = vmatprep.subr.bf16.mxu0 %v515_v0 }
  0x3a   :  { %439 = vmatpush3.bf16.msra.mxu0 %v465_v28 }
  0xef   :  { %v102_v19 = vpop.f32.mrb[0].mxu0 }
  0xf0   :  { %v103_v20 = vadd.f32 %v353_v18, %v102_v19  ;;  %v402_v21 = vpop.f32.mrb[1].mxu0 }
  0xf1   :  { %v105_v22 = vpop.f32.mrb[2].mxu0 }
  0xf2   :  { %v108_v23 = vmul.f32 0.01, %v103_v20  ;;  %v403_v24 = vpop.f32.mrb[3].mxu0 }
  0xf4   :  { %v109_v25 = vmax.f32 %v103_v20, %v108_v23 }
  0xf6   :  { %v110_v26 = vpack.c.bf16 %v109_v25, %v109_v25 }
  0xf8   :  { %421 = vmatmul.mubr.bf16.vlgmr.msra.gmra.mrb[0].mxu1 %v110_v26 }
 0x1cb   :  { %v216_v30 = vpop.f32.mrb[0].mxu1 }
 0x1cc   :  { %v217_v31 = vadd.f32 %v357_v29, %v216_v30  ;;  %v422_v32 = vpop.f32.mrb[1].mxu1 }
 0x1cd   :  { %v219_v33 = vpop.f32.mrb[2].mxu1 }
 0x1ce   :  { %v222_v34 = vmul.f32 0.01, %v217_v31  ;;  %v423_v35 = vpop.f32.mrb[3].mxu1 }
 0x1d0   :  { %v223_v36 = vmax.f32 %v217_v31, %v222_v34 }
 0x1d2   :  { %v224_v37 = vpack.c.bf16 %v223_v36, %v223_v36 }
 0x1d4   :  { %441 = vmatmul.mubr.bf16.vlgmr.msra.gmra.mrb[4].mxu0 %v224_v37 }
 0x2a7   :  { %v330_v39 = vpop.f32.mrb[4].mxu0 }
 0x2a8   :  { %v331_v40 = vadd.f32 %v366_v38, %v330_v39  ;;  %v442_v41 = vpop.f32.mrb[5].mxu0 }
 0x2a9   :  { %v333_v42 = vpop.f32.mrb[6].mxu0 }
 0x2aa   :  { %v443_v43 = vpop.f32.mrb[7].mxu0  ;;  %337 = vst.msk [vmem:[#allocation5] sm:$0xff] %vm336_vm2, %v331_v40 }
 0x2ab   :  { %499 = shalt.err (!%p496_p12)
}
 0x2ac   :  { %s500_s6 = scalar_lea.hbm %s676_s7, 128 }
 0x2ad   :  { %p501_p13 = scmp.ne.s32.totalorder %s676_s7, %s500_s6  ;;  %p504_p0 = scmp.lt.u32.totalorder %s500_s6, %s676_s7 }
 0x2af   :  { %p506_p1 = pnand %p504_p0, %p501_p13 }
 0x2b1   :  { %509 = shalt.err (!%p506_p1)
}
 0x2b2   :  { %347 = dma.vmem_to_hbm [thread:$0]  %s345_s5, 128, %s676_s7, [#allocation4]  }
 0x2b3   :  { %512 = dma.done.wait [#allocation4], 128  }
 0x2b4   :  { %513 = vsyncadd [#allocation4], 4294967168 }
 0x2b5   :  { %351 = vsyncpa [#allocation3], 1 }
 0x2b6   :  { %352 = vsyncpa [#allocation4], 1 }

</bundles_post_ra>
